<compile_context>
chip_gen: v5e
topology: v5e:2x2
jax: 0.10.0
libtpu: 0.0.40
codegen_flags: <defaults>
</compile_context>

<pallas_src>
import jax
import jax.numpy as jnp
from jax.experimental import pallas as pl
from jax.experimental.pallas import tpu as pltpu


def _round_up(v, m):
    return (v + m - 1) // m * m


def _vmem_bytes(Cin_p, Cout_p, K, pad_al, Lt, im2col1, im2col2):
    """Rough per-step VMEM working set: double-buffered I/O tiles, weights,
    persistent scratch, plus headroom for the live f32 temporaries."""
    b = 0
    b += 2 * Cin_p * Lt * 2                        # x tile (bf16, double-buffered)
    b += 2 * Cout_p * Lt * 2                       # out tile (bf16, double-buffered)
    w1_elems = (2 * Cout_p) * (K * Cin_p) if im2col1 else (K + 1) * Cout_p * Cin_p
    w2_elems = Cout_p * K * Cout_p
    b += 2 * (w1_elems + w2_elems) * 2             # weights (bf16, double-buffered)
    b += 2 * 3 * Cout_p * 4                        # biases (f32)
    b += Cin_p * (pad_al + Lt) * 2                 # carried x halo + staged tile
    b += Cout_p * (pad_al + Lt) * 2                # carried h1 halo + h1 tile
    if im2col1:
        b += K * Cin_p * Lt * 2                    # conv1 im2col scratch
    if im2col2:
        b += K * Cout_p * Lt * 2                   # conv2 im2col scratch
    b += 4 * Cout_p * Lt * 4                       # f32 live temps (fused acc, h2, res)
    return b


def _pick_time_tile(L, Cin_p, Cout_p, K, pad, budget):
    """Largest lane-dense (multiple of 128) time tile whose working set fits
    ~80% of the VMEM budget.  Whole-L in one tile is preferred when it fits."""
    pad_al = _round_up(pad, 128) if pad else 0
    im2col1 = Cin_p < 128
    im2col2 = Cout_p < 128
    l_full = _round_up(max(L, 1), 128)
    cands = [l_full] + [c for c in (8192, 4096, 2048, 1024, 512, 256, 128)
                        if c < l_full]
    for lt in cands:
        if _vmem_bytes(Cin_p, Cout_p, K, pad_al, lt, im2col1, im2col2) <= int(0.8 * budget):
            return lt
    return 128


def _make_temporal_block_kernel(K, dilation, pad, pad_al, Cin_p, Cout_p, Lt,
                                im2col1, im2col2):
    base = pad_al - pad            # first valid (read) column of the carried halo

    def kernel(x_ref, w1_ref, b1_ref, w2_ref, b2_ref, bd_ref, out_ref, *scratch):
        it = iter(scratch)
        xh_ref = next(it)          # (Cin_p,  pad_al + Lt) bf16, persists across L tiles
        h1_ref = next(it)          # (Cout_p, pad_al + Lt) bf16, persists across L tiles
        col1_ref = next(it) if im2col1 else None
        col2_ref = next(it) if im2col2 else None

        l = pl.program_id(1)

        # Fresh causal (zero) halo at the start of every batch row's L sweep.
        if pad_al:
            @pl.when(l == 0)
            def _():
                xh_ref[:, :pad_al] = jnp.zeros((Cin_p, pad_al), xh_ref.dtype)
                h1_ref[:, :pad_al] = jnp.zeros((Cout_p, pad_al), h1_ref.dtype)

        # Stage the current x tile next to the carried halo (lane-aligned store).
        xh_ref[:, pad_al:] = x_ref[0]

        # ---- conv1 (+ residual 1x1 fused as extra LHS rows) ----
        if im2col1:
            for t in range(K):                      # static unroll over taps
                off = base + t * dilation
                col1_ref[t * Cin_p:(t + 1) * Cin_p, :] = xh_ref[:, off:off + Lt]
            fused = jnp.dot(w1_ref[...], col1_ref[...],
                            preferred_element_type=jnp.float32)
            acc1 = fused[:Cout_p]
            res = fused[Cout_p:] + bd_ref[...]
        else:
            acc1 = jnp.zeros((Cout_p, Lt), jnp.float32)
            for t in range(K - 1):
                off = base + t * dilation
                acc1 = acc1 + jnp.dot(w1_ref[t * Cout_p:(t + 1) * Cout_p, :],
                                      xh_ref[:, off:off + Lt],
                                      preferred_element_type=jnp.float32)
            # Last tap's RHS is the lane-aligned current tile; the downsample
            # weight rides along as extra LHS rows (residual fusion).
            last = jnp.dot(w1_ref[(K - 1) * Cout_p:(K + 1) * Cout_p, :],
                           xh_ref[:, pad_al:],
                           preferred_element_type=jnp.float32)
            acc1 = acc1 + last[:Cout_p]
            res = last[Cout_p:] + bd_ref[...]

        h1 = jnp.maximum(acc1 + b1_ref[...], 0.0)       # relu1; dropout1(p=0) == id
        h1_ref[:, pad_al:] = h1.astype(h1_ref.dtype)    # lane-aligned bf16 store

        # ---- conv2 ----
        if im2col2:
            for t in range(K):
                off = base + t * dilation
                col2_ref[t * Cout_p:(t + 1) * Cout_p, :] = h1_ref[:, off:off + Lt]
            acc2 = jnp.dot(w2_ref[...], col2_ref[...],
                           preferred_element_type=jnp.float32)
        else:
            acc2 = jnp.zeros((Cout_p, Lt), jnp.float32)
            for t in range(K):
                off = base + t * dilation
                acc2 = acc2 + jnp.dot(w2_ref[t * Cout_p:(t + 1) * Cout_p, :],
                                      h1_ref[:, off:off + Lt],
                                      preferred_element_type=jnp.float32)

        h2 = jnp.maximum(acc2 + b2_ref[...], 0.0)       # relu2; dropout2(p=0) == id
        out_ref[0] = (h2 + res).astype(out_ref.dtype)

        # Carry the last `pad` columns of x and of h1 into the halo for the
        # next L tile (skipped on the last tile).
        if pad:
            @pl.when(l + 1 < pl.num_programs(1))
            def _():
                xh_ref[:, base:pad_al] = xh_ref[:, pad_al + Lt - pad:pad_al + Lt]
                h1_ref[:, base:pad_al] = h1_ref[:, pad_al + Lt - pad:pad_al + Lt]

    return kernel


def temporal_block_forward(x, w1, b1, w2, b2, wd=None, bd=None, *,
                           kernel_size, dilation, padding):
    """x: (N, Cin, L) f32.  w1:(Cout,Cin,K)  w2:(Cout,Cout,K)  wd:(Cout,Cin,1) or None.
    Returns (N, Cout, L) bf16 (consumer-tolerant; cast outside if f32 needed)."""
    N, Cin, L = x.shape
    Cout = w1.shape[0]
    K = kernel_size
    pad = padding
    assert pad == (K - 1) * dilation, \
        "TemporalBlock residual add requires padding == (kernel_size-1)*dilation (stride=1)"

    if wd is None:          # n_inputs == n_outputs -> identity residual
        assert Cin == Cout
        wd = jnp.eye(Cout, Cin, dtype=x.dtype)[:, :, None]
    if bd is None:
        bd = jnp.zeros((Cout,), x.dtype)

    # Channel padding to bf16 sublane packing (16); halo width lane-aligned.
    Cin_p = _round_up(Cin, 16)
    Cout_p = _round_up(Cout, 16)
    pad_al = _round_up(pad, 128) if pad else 0
    im2col1 = Cin_p < 128       # shallow channels -> deepen contraction via im2col
    im2col2 = Cout_p < 128

    # VMEM budget from actual chip capacity (v7x: 64 MiB, v5e/v6e: 128 MiB).
    try:
        cap = int(pltpu.get_tpu_info().vmem_capacity_bytes)
    except Exception:
        cap = 64 * 2**20        # conservative fallback
    budget = max(min(int(0.75 * cap), cap - 24 * 2**20), 16 * 2**20)

    Lt = _pick_time_tile(L, Cin_p, Cout_p, K, pad, budget)
    L_pad = _round_up(L, Lt)
    nL = L_pad // Lt

    # Input: right-pad time to a multiple of the tile (causal -> padding only
    # affects sliced-off columns), pad channels, cast to bf16 (halves HBM in).
    xb = jnp.pad(x, ((0, 0), (0, Cin_p - Cin), (0, L_pad - L))).astype(jnp.bfloat16)

    # --- weight packing (im2col layout or per-tap layout), residual fused into w1 ---
    w1_p = jnp.pad(w1, ((0, Cout_p - Cout), (0, Cin_p - Cin), (0, 0)))
    wd_p = jnp.pad(wd[:, :, 0], ((0, Cout_p - Cout), (0, Cin_p - Cin)))
    if im2col1:
        w1_rows = jnp.transpose(w1_p, (0, 2, 1)).reshape(Cout_p, K * Cin_p)
        wd_rows = jnp.concatenate(
            [jnp.zeros((Cout_p, (K - 1) * Cin_p), w1_rows.dtype), wd_p], axis=1)
        w1_f = jnp.concatenate([w1_rows, wd_rows], axis=0).astype(jnp.bfloat16)
    else:
        w1_taps = jnp.transpose(w1_p, (2, 0, 1)).reshape(K * Cout_p, Cin_p)
        w1_f = jnp.concatenate([w1_taps, wd_p], axis=0).astype(jnp.bfloat16)

    w2_p = jnp.pad(w2, ((0, Cout_p - Cout), (0, Cout_p - Cout), (0, 0)))
    if im2col2:
        w2_f = jnp.transpose(w2_p, (0, 2, 1)).reshape(Cout_p, K * Cout_p).astype(jnp.bfloat16)
    else:
        w2_f = jnp.transpose(w2_p, (2, 0, 1)).reshape(K * Cout_p, Cout_p).astype(jnp.bfloat16)

    b1_f = jnp.pad(b1, (0, Cout_p - Cout)).astype(jnp.float32).reshape(Cout_p, 1)
    b2_f = jnp.pad(b2, (0, Cout_p - Cout)).astype(jnp.float32).reshape(Cout_p, 1)
    bd_f = jnp.pad(bd, (0, Cout_p - Cout)).astype(jnp.float32).reshape(Cout_p, 1)

    kernel = _make_temporal_block_kernel(K, dilation, pad, pad_al,
                                         Cin_p, Cout_p, Lt, im2col1, im2col2)

    scratch = [pltpu.VMEM((Cin_p, pad_al + Lt), jnp.bfloat16),   # carried x halo + tile
               pltpu.VMEM((Cout_p, pad_al + Lt), jnp.bfloat16)]  # carried h1 halo + tile
    if im2col1:
        scratch.append(pltpu.VMEM((K * Cin_p, Lt), jnp.bfloat16))
    if im2col2:
        scratch.append(pltpu.VMEM((K * Cout_p, Lt), jnp.bfloat16))

    est = _vmem_bytes(Cin_p, Cout_p, K, pad_al, Lt, im2col1, im2col2)
    vmem_limit = int(min(max(budget, 2 * est), int(0.9 * cap)))
    vmem_limit = max(vmem_limit, 16 * 2**20)

    out = pl.pallas_call(
        kernel,
        out_shape=jax.ShapeDtypeStruct((N, Cout_p, L_pad), jnp.bfloat16),
        grid=(N, nL),
        in_specs=[
            pl.BlockSpec((1, Cin_p, Lt), lambda n, l: (n, 0, l)),   # x tile
            pl.BlockSpec(w1_f.shape, lambda n, l: (0, 0)),          # conv1 (+ fused wd)
            pl.BlockSpec((Cout_p, 1), lambda n, l: (0, 0)),         # b1
            pl.BlockSpec(w2_f.shape, lambda n, l: (0, 0)),          # conv2
            pl.BlockSpec((Cout_p, 1), lambda n, l: (0, 0)),         # b2
            pl.BlockSpec((Cout_p, 1), lambda n, l: (0, 0)),         # bd
        ],
        out_specs=pl.BlockSpec((1, Cout_p, Lt), lambda n, l: (n, 0, l)),
        scratch_shapes=scratch,
        compiler_params=pltpu.CompilerParams(
            dimension_semantics=("parallel", "arbitrary"),
            vmem_limit_bytes=vmem_limit),
    )(xb, w1_f, b1_f, w2_f, b2_f, bd_f)

    # TODO(synk): if the consumer tolerates the padded (Cout_p, L_pad) layout,
    # skip this slice to avoid an extra HBM->HBM copy.
    return out[:, :Cout, :L]


def _weight_norm(v, g):
    # PyTorch weight_norm default dim=0: per-output-channel norm over (Cin, K).
    norm = jnp.sqrt(jnp.sum(v * v, axis=(1, 2), keepdims=True))
    return g[:, None, None] * v / norm


def _reference(x, w1, b1, w2, b2, wd, bd, *, padding, dilation):
    """Pure-JAX (f32) reference replicating the PyTorch forward exactly."""
    dn = ("NCH", "OIH", "NCH")
    y = jax.lax.conv_general_dilated(
        x, w1, (1,), [(padding, padding)], rhs_dilation=(dilation,),
        dimension_numbers=dn) + b1[None, :, None]
    y = y[:, :, :-padding]                      # Chomp1d
    y = jnp.maximum(y, 0.0)
    y = jax.lax.conv_general_dilated(
        y, w2, (1,), [(padding, padding)], rhs_dilation=(dilation,),
        dimension_numbers=dn) + b2[None, :, None]
    y = y[:, :, :-padding]
    y = jnp.maximum(y, 0.0)
    res = jax.lax.conv_general_dilated(
        x, wd, (1,), [(0, 0)], dimension_numbers=dn) + bd[None, :, None]
    return y + res


if __name__ == "__main__":
    # Small config consistent with TemporalBlock(n_inputs, n_outputs, k, 1, d, (k-1)*d)
    N, Cin, Cout, L = 2, 4, 8, 16
    kernel_size, stride, dilation = 3, 1, 2
    padding = (kernel_size - 1) * dilation       # 4

    key = jax.random.PRNGKey(0)
    ks = jax.random.split(key, 9)

    x = jax.random.normal(ks[0], (N, Cin, L), jnp.float32)

    # conv1 (weight-normed)
    v1 = jax.random.normal(ks[1], (Cout, Cin, kernel_size), jnp.float32) * 0.1
    g1 = jax.random.uniform(ks[2], (Cout,), jnp.float32, 0.5, 1.5)
    b1 = jax.random.normal(ks[3], (Cout,), jnp.float32) * 0.1
    w1 = _weight_norm(v1, g1)

    # conv2 (weight-normed)
    v2 = jax.random.normal(ks[4], (Cout, Cout, kernel_size), jnp.float32) * 0.1
    g2 = jax.random.uniform(ks[5], (Cout,), jnp.float32, 0.5, 1.5)
    b2 = jax.random.normal(ks[6], (Cout,), jnp.float32) * 0.1
    w2 = _weight_norm(v2, g2)

    # downsample 1x1 conv (present since Cin != Cout)
    wd = jax.random.normal(ks[7], (Cout, Cin, 1), jnp.float32) * 0.1
    bd = jax.random.normal(ks[8], (Cout,), jnp.float32) * 0.1

    out = temporal_block_forward(
        x, w1, b1, w2, b2, wd, bd,
        kernel_size=kernel_size, dilation=dilation, padding=padding)
    out = jax.block_until_ready(out)

    ref = _reference(x, w1, b1, w2, b2, wd, bd,
                     padding=padding, dilation=dilation)
    ref = jax.block_until_ready(ref)

    assert out.shape == (N, Cout, L), out.shape
    # bf16 MXU operands + bf16 output (fp32 accumulation) -> loosened tolerance.
    assert jnp.allclose(out, ref, rtol=2e-2, atol=2e-2), \
        float(jnp.max(jnp.abs(out - ref)))
    print("KERNEL_OK")
</pallas_src>

<mosaic_0001>
module attributes {stable_mosaic.version = 11 : i64} {
  func.func @kernel(%arg0: i32, %arg1: i32, %arg2: memref<1x16x128xbf16, #tpu.memory_space<vmem>>, %arg3: memref<32x48xbf16, #tpu.memory_space<vmem>>, %arg4: memref<16x1xf32, #tpu.memory_space<vmem>>, %arg5: memref<16x48xbf16, #tpu.memory_space<vmem>>, %arg6: memref<16x1xf32, #tpu.memory_space<vmem>>, %arg7: memref<16x1xf32, #tpu.memory_space<vmem>>, %arg8: memref<1x16x128xbf16, #tpu.memory_space<vmem>>, %arg9: memref<16x256xbf16, #tpu.memory_space<vmem>>, %arg10: memref<16x256xbf16, #tpu.memory_space<vmem>>, %arg11: memref<48x128xbf16, #tpu.memory_space<vmem>>, %arg12: memref<48x128xbf16, #tpu.memory_space<vmem>>) attributes {dimension_semantics = [#tpu.dimension_semantics<parallel>, #tpu.dimension_semantics<arbitrary>], iteration_bounds = array<i64: 2, 1>, scalar_prefetch = 0 : i64, scratch_operands = 4 : i64, tpu.core_type = #tpu.core_type<tc>, window_params = [{transform_indices = @transform_0, window_bounds = array<i64: 1, 16, 128>}, {pipeline_mode = #tpu.pipeline_mode<synchronous>, transform_indices = @transform_1, window_bounds = array<i64: 32, 48>}, {pipeline_mode = #tpu.pipeline_mode<synchronous>, transform_indices = @transform_2, window_bounds = array<i64: 16, 1>}, {pipeline_mode = #tpu.pipeline_mode<synchronous>, transform_indices = @transform_3, window_bounds = array<i64: 16, 48>}, {pipeline_mode = #tpu.pipeline_mode<synchronous>, transform_indices = @transform_4, window_bounds = array<i64: 16, 1>}, {pipeline_mode = #tpu.pipeline_mode<synchronous>, transform_indices = @transform_5, window_bounds = array<i64: 16, 1>}, {transform_indices = @transform_6, window_bounds = array<i64: 1, 16, 128>}]} {
    %c0_i32 = arith.constant 0 : i32
    %0 = arith.cmpi eq, %arg1, %c0_i32 : i32
    %1 = arith.extui %0 : i1 to i32
    %c0_i32_0 = arith.constant 0 : i32
    %2 = arith.cmpi ne, %1, %c0_i32_0 : i32
    scf.if %2 {
      %cst_48 = arith.constant 0.000000e+00 : bf16
      %50 = vector.broadcast %cst_48 : bf16 to vector<16x128xbf16>
      %c0_49 = arith.constant 0 : index
      %c0_50 = arith.constant 0 : index
      %51 = vector.load %arg9[%c0_49, %c0_50] : memref<16x256xbf16, #tpu.memory_space<vmem>>, vector<16x128xbf16>
      tpu.vector_store %arg9[%c0_49, %c0_50], %50 {strides = array<i32>} : memref<16x256xbf16, #tpu.memory_space<vmem>>, vector<16x128xbf16>,
      %cst_51 = arith.constant 0.000000e+00 : bf16
      %52 = vector.broadcast %cst_51 : bf16 to vector<16x128xbf16>
      %c0_52 = arith.constant 0 : index
      %c0_53 = arith.constant 0 : index
      %53 = vector.load %arg10[%c0_52, %c0_53] : memref<16x256xbf16, #tpu.memory_space<vmem>>, vector<16x128xbf16>
      tpu.vector_store %arg10[%c0_52, %c0_53], %52 {strides = array<i32>} : memref<16x256xbf16, #tpu.memory_space<vmem>>, vector<16x128xbf16>,
    } else {
    }
    %c0 = arith.constant 0 : index
    %c0_1 = arith.constant 0 : index
    %c0_2 = arith.constant 0 : index
    %3 = vector.load %arg2[%c0, %c0_1, %c0_2] : memref<1x16x128xbf16, #tpu.memory_space<vmem>>, vector<1x16x128xbf16>
    %4 = vector.shape_cast %3 : vector<1x16x128xbf16> to vector<16x128xbf16>
    %c0_3 = arith.constant 0 : index
    %c128 = arith.constant 128 : index
    %5 = vector.load %arg9[%c0_3, %c128] : memref<16x256xbf16, #tpu.memory_space<vmem>>, vector<16x128xbf16>
    tpu.vector_store %arg9[%c0_3, %c128], %4 {strides = array<i32>} : memref<16x256xbf16, #tpu.memory_space<vmem>>, vector<16x128xbf16>,
    %c0_4 = arith.constant 0 : index
    %c124 = arith.constant 124 : index
    %6 = vector.load %arg9[%c0_4, %c124] : memref<16x256xbf16, #tpu.memory_space<vmem>>, vector<16x128xbf16>
    %c0_5 = arith.constant 0 : index
    %c0_6 = arith.constant 0 : index
    %7 = vector.load %arg11[%c0_5, %c0_6] : memref<48x128xbf16, #tpu.memory_space<vmem>>, vector<16x128xbf16>
    tpu.vector_store %arg11[%c0_5, %c0_6], %6 {strides = array<i32>} : memref<48x128xbf16, #tpu.memory_space<vmem>>, vector<16x128xbf16>,
    %c0_7 = arith.constant 0 : index
    %c126 = arith.constant 126 : index
    %8 = vector.load %arg9[%c0_7, %c126] : memref<16x256xbf16, #tpu.memory_space<vmem>>, vector<16x128xbf16>
    %c16 = arith.constant 16 : index
    %c0_8 = arith.constant 0 : index
    %9 = vector.load %arg11[%c16, %c0_8] : memref<48x128xbf16, #tpu.memory_space<vmem>>, vector<16x128xbf16>
    tpu.vector_store %arg11[%c16, %c0_8], %8 {strides = array<i32>} : memref<48x128xbf16, #tpu.memory_space<vmem>>, vector<16x128xbf16>,
    %c0_9 = arith.constant 0 : index
    %c128_10 = arith.constant 128 : index
    %10 = vector.load %arg9[%c0_9, %c128_10] : memref<16x256xbf16, #tpu.memory_space<vmem>>, vector<16x128xbf16>
    %c32 = arith.constant 32 : index
    %c0_11 = arith.constant 0 : index
    %11 = vector.load %arg11[%c32, %c0_11] : memref<48x128xbf16, #tpu.memory_space<vmem>>, vector<16x128xbf16>
    tpu.vector_store %arg11[%c32, %c0_11], %10 {strides = array<i32>} : memref<48x128xbf16, #tpu.memory_space<vmem>>, vector<16x128xbf16>,
    %c0_12 = arith.constant 0 : index
    %c0_13 = arith.constant 0 : index
    %12 = vector.load %arg3[%c0_12, %c0_13] : memref<32x48xbf16, #tpu.memory_space<vmem>>, vector<32x48xbf16>
    %c0_14 = arith.constant 0 : index
    %c0_15 = arith.constant 0 : index
    %13 = vector.load %arg11[%c0_14, %c0_15] : memref<48x128xbf16, #tpu.memory_space<vmem>>, vector<48x128xbf16>
    %cst = arith.constant dense<0.000000e+00> : vector<32x128xf32>
    %14 = tpu.matmul %12, %13, %cst {dimension_numbers = #tpu.dot_dimension_numbers<[1], [0], [0], [1], [0, 0, 1, 1], [], []>} : vector<32x48xbf16>, vector<48x128xbf16>, vector<32x128xf32> -> vector<32x128xf32>
    %15 = vector.extract_strided_slice %14 {offsets = [0, 0], sizes = [16, 128], strides = [1, 1]} : vector<32x128xf32> to vector<16x128xf32>
    %16 = vector.extract_strided_slice %14 {offsets = [16, 0], sizes = [16, 128], strides = [1, 1]} : vector<32x128xf32> to vector<16x128xf32>
    %c0_16 = arith.constant 0 : index
    %c0_17 = arith.constant 0 : index
    %17 = vector.load %arg7[%c0_16, %c0_17] : memref<16x1xf32, #tpu.memory_space<vmem>>, vector<16x1xf32>
    %18 = vector.broadcast %17 : vector<16x1xf32> to vector<16x128xf32>
    %19 = arith.addf %16, %18 : vector<16x128xf32>
    %c0_18 = arith.constant 0 : index
    %c0_19 = arith.constant 0 : index
    %20 = vector.load %arg4[%c0_18, %c0_19] : memref<16x1xf32, #tpu.memory_space<vmem>>, vector<16x1xf32>
    %21 = vector.broadcast %20 : vector<16x1xf32> to vector<16x128xf32>
    %22 = arith.addf %15, %21 : vector<16x128xf32>
    %cst_20 = arith.constant 0.000000e+00 : f32
    %23 = vector.broadcast %cst_20 : f32 to vector<16x128xf32>
    %24 = arith.maximumf %22, %23 : vector<16x128xf32>
    %25 = arith.truncf %24 : vector<16x128xf32> to vector<16x128xbf16>
    %c0_21 = arith.constant 0 : index
    %c128_22 = arith.constant 128 : index
    %26 = vector.load %arg10[%c0_21, %c128_22] : memref<16x256xbf16, #tpu.memory_space<vmem>>, vector<16x128xbf16>
    tpu.vector_store %arg10[%c0_21, %c128_22], %25 {strides = array<i32>} : memref<16x256xbf16, #tpu.memory_space<vmem>>, vector<16x128xbf16>,
    %c0_23 = arith.constant 0 : index
    %c124_24 = arith.constant 124 : index
    %27 = vector.load %arg10[%c0_23, %c124_24] : memref<16x256xbf16, #tpu.memory_space<vmem>>, vector<16x128xbf16>
    %c0_25 = arith.constant 0 : index
    %c0_26 = arith.constant 0 : index
    %28 = vector.load %arg12[%c0_25, %c0_26] : memref<48x128xbf16, #tpu.memory_space<vmem>>, vector<16x128xbf16>
    tpu.vector_store %arg12[%c0_25, %c0_26], %27 {strides = array<i32>} : memref<48x128xbf16, #tpu.memory_space<vmem>>, vector<16x128xbf16>,
    %c0_27 = arith.constant 0 : index
    %c126_28 = arith.constant 126 : index
    %29 = vector.load %arg10[%c0_27, %c126_28] : memref<16x256xbf16, #tpu.memory_space<vmem>>, vector<16x128xbf16>
    %c16_29 = arith.constant 16 : index
    %c0_30 = arith.constant 0 : index
    %30 = vector.load %arg12[%c16_29, %c0_30] : memref<48x128xbf16, #tpu.memory_space<vmem>>, vector<16x128xbf16>
    tpu.vector_store %arg12[%c16_29, %c0_30], %29 {strides = array<i32>} : memref<48x128xbf16, #tpu.memory_space<vmem>>, vector<16x128xbf16>,
    %c0_31 = arith.constant 0 : index
    %c128_32 = arith.constant 128 : index
    %31 = vector.load %arg10[%c0_31, %c128_32] : memref<16x256xbf16, #tpu.memory_space<vmem>>, vector<16x128xbf16>
    %c32_33 = arith.constant 32 : index
    %c0_34 = arith.constant 0 : index
    %32 = vector.load %arg12[%c32_33, %c0_34] : memref<48x128xbf16, #tpu.memory_space<vmem>>, vector<16x128xbf16>
    tpu.vector_store %arg12[%c32_33, %c0_34], %31 {strides = array<i32>} : memref<48x128xbf16, #tpu.memory_space<vmem>>, vector<16x128xbf16>,
    %c0_35 = arith.constant 0 : index
    %c0_36 = arith.constant 0 : index
    %33 = vector.load %arg5[%c0_35, %c0_36] : memref<16x48xbf16, #tpu.memory_space<vmem>>, vector<16x48xbf16>
    %c0_37 = arith.constant 0 : index
    %c0_38 = arith.constant 0 : index
    %34 = vector.load %arg12[%c0_37, %c0_38] : memref<48x128xbf16, #tpu.memory_space<vmem>>, vector<48x128xbf16>
    %cst_39 = arith.constant dense<0.000000e+00> : vector<16x128xf32>
    %35 = tpu.matmul %33, %34, %cst_39 {dimension_numbers = #tpu.dot_dimension_numbers<[1], [0], [0], [1], [0, 0, 1, 1], [], []>} : vector<16x48xbf16>, vector<48x128xbf16>, vector<16x128xf32> -> vector<16x128xf32>
    %c0_40 = arith.constant 0 : index
    %c0_41 = arith.constant 0 : index
    %36 = vector.load %arg6[%c0_40, %c0_41] : memref<16x1xf32, #tpu.memory_space<vmem>>, vector<16x1xf32>
    %37 = vector.broadcast %36 : vector<16x1xf32> to vector<16x128xf32>
    %38 = arith.addf %35, %37 : vector<16x128xf32>
    %cst_42 = arith.constant 0.000000e+00 : f32
    %39 = vector.broadcast %cst_42 : f32 to vector<16x128xf32>
    %40 = arith.maximumf %38, %39 : vector<16x128xf32>
    %41 = arith.addf %40, %19 : vector<16x128xf32>
    %42 = arith.truncf %41 : vector<16x128xf32> to vector<16x128xbf16>
    %c0_43 = arith.constant 0 : index
    %c0_44 = arith.constant 0 : index
    %c0_45 = arith.constant 0 : index
    %43 = vector.load %arg8[%c0_43, %c0_44, %c0_45] : memref<1x16x128xbf16, #tpu.memory_space<vmem>>, vector<1x16x128xbf16>
    %44 = vector.shape_cast %43 : vector<1x16x128xbf16> to vector<16x128xbf16>
    %45 = vector.shape_cast %42 : vector<16x128xbf16> to vector<1x16x128xbf16>
    tpu.vector_store %arg8[%c0_43, %c0_44, %c0_45], %45 {strides = array<i32>} : memref<1x16x128xbf16, #tpu.memory_space<vmem>>, vector<1x16x128xbf16>,
    %c1_i32 = arith.constant 1 : i32
    %46 = arith.addi %arg1, %c1_i32 : i32
    %c1_i32_46 = arith.constant 1 : i32
    %47 = arith.cmpi slt, %46, %c1_i32_46 : i32
    %48 = arith.extui %47 : i1 to i32
    %c0_i32_47 = arith.constant 0 : i32
    %49 = arith.cmpi ne, %48, %c0_i32_47 : i32
    scf.if %49 {
      %c0_48 = arith.constant 0 : index
      %c252 = arith.constant 252 : index
      %50 = vector.load %arg9[%c0_48, %c252] : memref<16x256xbf16, #tpu.memory_space<vmem>>, vector<16x4xbf16>
      %c0_49 = arith.constant 0 : index
      %c124_50 = arith.constant 124 : index
      %51 = vector.load %arg9[%c0_49, %c124_50] : memref<16x256xbf16, #tpu.memory_space<vmem>>, vector<16x4xbf16>
      tpu.vector_store %arg9[%c0_49, %c124_50], %50 {strides = array<i32>} : memref<16x256xbf16, #tpu.memory_space<vmem>>, vector<16x4xbf16>,
      %c0_51 = arith.constant 0 : index
      %c252_52 = arith.constant 252 : index
      %52 = vector.load %arg10[%c0_51, %c252_52] : memref<16x256xbf16, #tpu.memory_space<vmem>>, vector<16x4xbf16>
      %c0_53 = arith.constant 0 : index
      %c124_54 = arith.constant 124 : index
      %53 = vector.load %arg10[%c0_53, %c124_54] : memref<16x256xbf16, #tpu.memory_space<vmem>>, vector<16x4xbf16>
      tpu.vector_store %arg10[%c0_53, %c124_54], %52 {strides = array<i32>} : memref<16x256xbf16, #tpu.memory_space<vmem>>, vector<16x4xbf16>,
    } else {
    }
    return
  }
  func.func @transform_0(%arg0: i32, %arg1: i32) -> (i32, i32, i32) {
    %c0_i32 = arith.constant 0 : i32
    %c0_i32_0 = arith.constant 0 : i32
    return %arg0, %c0_i32, %arg1 : i32, i32, i32
  }
  func.func @transform_1(%arg0: i32, %arg1: i32) -> (i32, i32) {
    %c0_i32 = arith.constant 0 : i32
    %c0_i32_0 = arith.constant 0 : i32
    %c0_i32_1 = arith.constant 0 : i32
    return %c0_i32, %c0_i32_0 : i32, i32
  }
  func.func @transform_2(%arg0: i32, %arg1: i32) -> (i32, i32) {
    %c0_i32 = arith.constant 0 : i32
    %c0_i32_0 = arith.constant 0 : i32
    %c0_i32_1 = arith.constant 0 : i32
    return %c0_i32, %c0_i32_0 : i32, i32
  }
  func.func @transform_3(%arg0: i32, %arg1: i32) -> (i32, i32) {
    %c0_i32 = arith.constant 0 : i32
    %c0_i32_0 = arith.constant 0 : i32
    %c0_i32_1 = arith.constant 0 : i32
    return %c0_i32, %c0_i32_0 : i32, i32
  }
  func.func @transform_4(%arg0: i32, %arg1: i32) -> (i32, i32) {
    %c0_i32 = arith.constant 0 : i32
    %c0_i32_0 = arith.constant 0 : i32
    %c0_i32_1 = arith.constant 0 : i32
    return %c0_i32, %c0_i32_0 : i32, i32
  }
  func.func @transform_5(%arg0: i32, %arg1: i32) -> (i32, i32) {
    %c0_i32 = arith.constant 0 : i32
    %c0_i32_0 = arith.constant 0 : i32
    %c0_i32_1 = arith.constant 0 : i32
    return %c0_i32, %c0_i32_0 : i32, i32
  }
  func.func @transform_6(%arg0: i32, %arg1: i32) -> (i32, i32, i32) {
    %c0_i32 = arith.constant 0 : i32
    %c0_i32_0 = arith.constant 0 : i32
    return %arg0, %c0_i32, %arg1 : i32, i32, i32
  }
}

</mosaic_0001>

<bundles_post_ra>
// kernel: tpu_custom_call.1
= control target key start
LH: loop header
LB: loop body
LE: loop exit
PB: predicated region body
PF: predicated region fallthrough
CT: control target
= control target key end

     0   :  { %11 = vsyncpa [#allocation7], 0  ;;  %s1033_s0 = inlined_call_operand.vmem [shape: bf16[2,16,128], index: 0, kind: input, shape index: {}]   ;;  %s1034_s1 = inlined_call_operand.vmem [shape: bf16[32,48], index: 1, kind: input, shape index: {}]   ;;  %s1035_s2 = inlined_call_operand.vmem [shape: f32[16,1], index: 2, kind: input, shape index: {}]   ;;  %s1036_s3 = inlined_call_operand.vmem [shape: bf16[16,48], index: 3, kind: input, shape index: {}]   ;;  %s1037_s4 = inlined_call_operand.vmem [shape: f32[16,1], index: 4, kind: input, shape index: {}]   ;;  %s1038_s5 = inlined_call_operand.vmem [shape: f32[16,1], index: 5, kind: input, shape index: {}]   ;;  %s1039_s6 = inlined_call_operand.hbm [shape: bf16[2,16,128], index: 6, kind: output, shape index: {}]  }
   0x1   :  { %13 = vsyncpa [#allocation7 + $0x1], 0  ;;  %s889_s21 = smov 0   ;;  %s891_s22 = smov 0  }
   0x2   :  { %s893_s23 = smov 0   ;;  %s895_s24 = smov 0  }
   0x3   :  { %s897_s25 = smov 0   ;;  %s899_s26 = smov 0  }
   0x4 LB: > { %s637_s27 = sadd.s32 4294967295, %s848_s26   ;;  %s638_s28 = sadd.s32 4294967294, %s848_s26   ;;  %s848_s26 = sphi %s899_s26, %s19_s26   ;;  %s844_s25 = sphi %s897_s25, %s1046_s25   ;;  %s840_s24 = sphi %s895_s24, %s1045_s24   ;;  %s836_s23 = sphi %s893_s23, %s1044_s23   ;;  %s832_s22 = sphi %s891_s22, %s1043_s22   ;;  %s828_s21 = sphi %s889_s21, %s1042_s21  }
   0x5   : > { %s31_s29 = sadd.s32 1, %s844_s25  ;;  %s173_s30 = sadd.s32 1, %s836_s23 }
   0x6   : > { %p33_p0 = scmp.ge.s32.totalorder %s31_s29, 2  ;;  %p183_p1 = scmp.ne.s32.totalorder %s836_s23, %s832_s22 }
   0x7   : > { %p184_p2 = scmp.eq.s32.totalorder %s637_s27, 1  ;;  %p189_p3 = scmp.ne.s32.totalorder %s832_s22, %s828_s21 }
   0x8   : > { %s1048_s29 = smov (%p33_p0, %s31_s29), 0  ;;  %p190_p5 = scmp.eq.s32.totalorder %s638_s28, 1 }
   0x9   : > { %p929_p4 = por %p184_p2, %p183_p1  ;;  %s168_s8 = ssub.s32 %s844_s25, %s1048_s29 }
   0xa   : > { %p641_p6 = scmp.ge.s32.totalorder %s848_s26, 1  ;;  %p171_p7 = scmp.eq.s32.totalorder %s168_s8, 0 }
   0xb   : > { %p936_p8 = por %p190_p5, %p189_p3  ;;  %p234_p9 = scmp.lt.s32.totalorder %s848_s26, 3 }
   0xc   : > { %s942_s10 = scalar_select %p171_p7, %s836_s23, %s173_s30  }
   0xd   : > { %p235_p10 = pnand %p641_p6, %p234_p9 }
   0xe   : > { %p267_p11 = scmp.lt.s32.totalorder (!%p235_p10), %s840_s24, 1  ;;  %s851_s16 = smov (!%p235_p10), 2  }
   0xf   : > { %238 = sbr.rel (%p235_p10) target bundleno = 601 (0x259), region = 44  ;;  %s852_s17 = smov (!%p235_p10), 4  }
  0x10   : > { %s264_s30 = sand.u32 (!%p235_p10), 1, %s832_s22  }
  0x11   : > { %s642_s8 = sshll.u32 (!%p235_p10), %s264_s30, 3 }
  0x14   : > { %v850_v0 = vmov 0   ;;  %s268_s11 = scalar_select %p267_p11, %s840_s24, 1  ;;  %v404_v8 = vld [vmem:[%s1035_s2] sm:$0xff]  ;;  %vm315_vm0 = vcmask 15360   ;;  %vm298_vm1 = vcmask 31744   ;;  %v405_v13 = vld [vmem:[%s1035_s2 + $0x8] sm:$0xff] }
  0x15   : > { %280 = vst [vmem:[#allocation2] sm:$0xf] %v850_v0  ;;  %767 = vset.pattern.permute.xlu2 %v850_v0  ;;  %768 = vset.pattern.permute.xlu1 %v850_v0  ;;  %v690_v24 = vld [vmem:[%s1034_s1] sm:$0xff]  ;;  %vm364_vm2 = vcmask 392192   ;;  %v469_v37 = vld [vmem:[%s1037_s4 + $0x8] sm:$0xff] }
  0x16   : > { %281 = vst [vmem:[#allocation2 + $0x8] sm:$0xf] %v850_v0  ;;  %769 = vset.pattern.permute.xlu0 %v850_v0  ;;  %s689_s12 = sshll.u32 %s268_s11, 3  ;;  %408 = vperm.xlu2 %767, %v404_v8   ;;  %v691_v44 = vld [vmem:[%s1034_s1 + $0x8] sm:$0xff]  ;;  %v468_v45 = vld [vmem:[%s1037_s4] sm:$0xff]  ;;  %s699_s11 = sshll.u32 %s840_s24, 3 }
  0x17   : > { %282 = vst [vmem:[#allocation3] sm:$0xf] %v850_v0  ;;  %s274_s15 = scalar_lea.vmem %s1033_s0, %s689_s12  ;;  %v390_v46 = vld [vmem:[%s1038_s5] sm:$0xff]  ;;  %v391_v49 = vld [vmem:[%s1038_s5 + $0x8] sm:$0xff]  ;;  %s555_s14 = scalar_lea.hbm %s1039_s6, %s699_s11 }
  0x18   : > { %283 = vst [vmem:[#allocation3 + $0x8] sm:$0xf] %v850_v0  ;;  %v284_v1 = vld [vmem:[%s274_s15] sm:$0xf]  ;;  %v285_v2 = vld [vmem:[%s274_s15 + $0x4] sm:$0xf] }
  0x19   : > { %286 = vst [vmem:[#allocation2 + $0x4] sm:$0xf] %v284_v1  ;;  %v695_v59 = vld [vmem:[%s1036_s3] sm:$0xff]  ;;  %s266_s15 = scalar_lea.vmem [#allocation6], %s642_s8  ;;  %s558_s18 = sshll.u32 %s555_s14, 4  ;;  %s559_s18 = int_to_ptr.hbm [resolvable:$true] %s558_s18 }
  0x1a   : > { %287 = vst [vmem:[#allocation2 + $0xc] sm:$0xf] %v285_v2  ;;  %s543_s24 = scalar_lea.sflag [#allocation7], %s264_s30  ;;  %s784_s19 = sshra.s32 %s559_s18, 4  ;;  %s785_s19 = int_to_ptr.hbm [resolvable:$true] %s784_s19 }
  0x1b   : > { %s786_s20 = scalar_lea.hbm %s785_s19, 8  ;;  %s790_s8 = scalar_lea.hbm %s1039_s6, 16 }
  0x1c   : > { %p787_p12 = scmp.ne.s32.totalorder %s785_s19, %s786_s20  ;;  %p791_p1 = scmp.lt.s32.totalorder %s785_s19, %s1039_s6 }
  0x1d   : > { %p792_p2 = scmp.lt.s32.totalorder %s790_s8, %s786_s20 }
  0x1e   : > { %413 = vperm.xlu2 %767, %v405_v13   ;;  %p788_p13 = pnand %p787_p12, %p929_p4 }
  0x1f   : > { %p793_p3 = por %p792_p2, %p791_p1 }
  0x20   : > { %v305_v3 = vld [vmem:[#allocation2] sm:$0xff]  ;;  %p789_p0 = pneg %p788_p13 }
  0x21   : > { %309 = vrot.lane.b32.xlu0 %v305_v3, %s851_s16  ;;  %292 = vrot.lane.b32.xlu1 %v305_v3, %s852_s17  ;;  %v306_v4 = vld [vmem:[#allocation2 + $0x8] sm:$0xff]  ;;  %v322_v5 = vld [vmem:[#allocation2 + $0x4] sm:$0xf] }
  0x22   : > { %v323_v6 = vld [vmem:[#allocation2 + $0xc] sm:$0xf]  ;;  %324 = vst [vmem:[#allocation4 + $0x10] sm:$0xf] %v322_v5  ;;  %p794_p5 = pnand %p793_p3, %p789_p0 }
  0x23   : > { %325 = vst [vmem:[#allocation4 + $0x14] sm:$0xf] %v323_v6 }
  0x29   : > { %311 = vrot.lane.b32.xlu0 %v306_v4, %s851_s16  ;;  %294 = vrot.lane.b32.xlu1 %v306_v4, %s852_s17 }
  0x2a   : > { %v694_v7 = vld [vmem:[#allocation4 + $0x10] sm:$0xff] }
  0x2b   : > { %376 = vmatpush.bf16.msra.mxu0 %v694_v7  ;;  %705 = vmatpush.bf16.msra.mxu2 %v694_v7 }
  0x70   : > { %v409_v25 = vpop.permute.xlu2 %408 }
  0x78   : > { %v414_v30 = vpop.permute.xlu2 %413 }
  0x93   : > { %v310_v9 = vpop.permute.xlu0 %309  ;;  %v293_v10 = vpop.permute.xlu1 %292 }
  0x94   : > { %v313_v11 = vrot.slane %v310_v9, 4  ;;  %v296_v12 = vrot.slane %v293_v10, 4 }
  0x96   : > { %v316_v14 = vsel %vm315_vm0, %v310_v9, %v313_v11  ;;  %v299_v15 = vsel %vm298_vm1, %v293_v10, %v296_v12 }
  0x97   : > { %320 = vst [vmem:[#allocation4 + $0x8] sm:$0xf] %v316_v14 }
  0x98   : > { %303 = vst [vmem:[#allocation4] sm:$0xf] %v299_v15 }
  0x9b   : > { %v312_v16 = vpop.permute.xlu0 %311  ;;  %v295_v17 = vpop.permute.xlu1 %294 }
  0x9c   : > { %v314_v18 = vrot.slane %v312_v16, 4  ;;  %v297_v19 = vrot.slane %v295_v17, 4 }
  0x9e   : > { %v317_v20 = vsel %vm315_vm0, %v312_v16, %v314_v18  ;;  %v300_v21 = vsel %vm298_vm1, %v295_v17, %v297_v19 }
  0x9f   : > { %321 = vst [vmem:[#allocation4 + $0xc] sm:$0xf] %v317_v20 }
  0xa0   : > { %304 = vst [vmem:[#allocation4 + $0x4] sm:$0xf] %v300_v21 }
  0xa6   : > { %v693_v22 = vld [vmem:[#allocation4 + $0x8] sm:$0xff] }
  0xa7   : > { %377 = vmatpush.bf16.msra.mxu0 %v693_v22  ;;  %706 = vmatpush.bf16.msra.mxu2 %v693_v22  ;;  %v692_v23 = vld [vmem:[#allocation4] sm:$0xff] }
  0xab   : > { %378 = vmatpush.bf16.msra.mxu0 %v692_v23  ;;  %707 = vmatpush.bf16.msra.mxu2 %v692_v23 }
  0xae   : > { %665 = vmatmul.msk.bf16.vlgmr.msra.gmra.mxu0 %vm364_vm2, %v690_v24  ;;  %666 = vmatmul.msk.bf16.vlgmr.msra.gmra.mxu2 %vm364_vm2, %v691_v44 }
 0x12b   : > { %v380_v26 = vpop.f32.mrf.mxu0 }
 0x12c   : > { %v416_v27 = vadd.f32 %v409_v25, %v380_v26 }
 0x12e   : > { %v418_v28 = vmax.f32 %v416_v27, 0.0 }
 0x130   : > { %v420_v29 = vpack.c.bf16 %v418_v28, %v418_v28 }
 0x131   : > { %v385_v60 = vpop.f32.mrf.mxu2 }
 0x132   : > { %422 = vst [vmem:[#allocation3 + $0x4] sm:$0xf] %v420_v29 }
 0x133   : > { %v382_v31 = vpop.f32.mrf.mxu0 }
 0x134   : > { %v417_v32 = vadd.f32 %v414_v30, %v382_v31 }
 0x136   : > { %v419_v33 = vmax.f32 %v417_v32, 0.0 }
 0x138   : > { %v421_v34 = vpack.c.bf16 %v419_v33, %v419_v33 }
 0x139   : > { %v440_v35 = vld [vmem:[#allocation3] sm:$0xff]  ;;  %v387_v2 = vpop.f32.mrf.mxu2 }
 0x13a   : > { %v456_v36 = vld [vmem:[#allocation3 + $0x4] sm:$0xf]  ;;  %423 = vst [vmem:[#allocation3 + $0xc] sm:$0xf] %v421_v34  ;;  %444 = vrot.lane.b32.xlu0 %v440_v35, %s851_s16  ;;  %428 = vrot.lane.b32.xlu2 %v440_v35, %s852_s17 }
 0x13b   : > { %458 = vst [vmem:[#allocation5 + $0x10] sm:$0xf] %v456_v36 }
 0x141   : > { %v441_v38 = vld [vmem:[#allocation3 + $0x8] sm:$0xff] }
 0x142   : > { %v457_v39 = vld [vmem:[#allocation3 + $0xc] sm:$0xf]  ;;  %477 = vperm.xlu2 %767, %v469_v37   ;;  %446 = vrot.lane.b32.xlu1 %v441_v38, %s851_s16  ;;  %s556_s16 = sshll.u32 %s266_s15, 4  ;;  %s557_s16 = int_to_ptr.vmem [resolvable:$true] %s556_s16 }
 0x143   : > { %459 = vst [vmem:[#allocation5 + $0x14] sm:$0xf] %v457_v39  ;;  %430 = vrot.lane.b32.xlu0 %v441_v38, %s852_s17 }
 0x14a   : > { %v698_v40 = vld [vmem:[#allocation5 + $0x10] sm:$0xff]  ;;  %472 = vperm.xlu1 %768, %v468_v45  }
 0x14b   : > { %511 = vmatpush.bf16.msra.mxu1 %v698_v40  ;;  %394 = vperm.xlu0 %769, %v390_v46  }
 0x152   : > { %399 = vperm.xlu1 %768, %v391_v49  }
 0x194   : > { %v429_v41 = vpop.permute.xlu2 %428 }
 0x195   : > { %v432_v42 = vrot.slane %v429_v41, 4 }
 0x197   : > { %v434_v43 = vsel %vm298_vm1, %v429_v41, %v432_v42 }
 0x198   : > { %438 = vst [vmem:[#allocation5] sm:$0xf] %v434_v43 }
 0x19c   : > { %v478_v1 = vpop.permute.xlu2 %477 }
 0x1ac   : > { %v445_v47 = vpop.permute.xlu0 %444 }
 0x1ad   : > { %v448_v48 = vrot.slane %v445_v47, 4 }
 0x1af   : > { %v450_v50 = vsel %vm315_vm0, %v445_v47, %v448_v48 }
 0x1b0   : > { %454 = vst [vmem:[#allocation5 + $0x8] sm:$0xf] %v450_v50 }
 0x1b4   : > { %v447_v51 = vpop.permute.xlu1 %446 }
 0x1b5   : > { %v449_v52 = vrot.slane %v447_v51, 4  ;;  %v431_v53 = vpop.permute.xlu0 %430 }
 0x1b6   : > { %v433_v54 = vrot.slane %v431_v53, 4 }
 0x1b7   : > { %v451_v55 = vsel %vm315_vm0, %v447_v51, %v449_v52 }
 0x1b8   : > { %455 = vst [vmem:[#allocation5 + $0xc] sm:$0xf] %v451_v55  ;;  %v435_v56 = vsel %vm298_vm1, %v431_v53, %v433_v54 }
 0x1b9   : > { %439 = vst [vmem:[#allocation5 + $0x4] sm:$0xf] %v435_v56 }
 0x1bc   : > { %v473_v61 = vpop.permute.xlu1 %472 }
 0x1bd   : > { %v395_v0 = vpop.permute.xlu0 %394 }
 0x1be   : > { %v402_v6 = vadd.f32 %v395_v0, %v385_v60 }
 0x1bf   : > { %v697_v57 = vld [vmem:[#allocation5 + $0x8] sm:$0xff] }
 0x1c0   : > { %512 = vmatpush.bf16.msra.mxu1 %v697_v57  ;;  %v696_v58 = vld [vmem:[#allocation5] sm:$0xff] }
 0x1c4   : > { %513 = vmatpush.bf16.msra.mxu1 %v696_v58  ;;  %v400_v3 = vpop.permute.xlu1 %399 }
 0x1c5   : > { %v403_v8 = vadd.f32 %v400_v3, %v387_v2 }
 0x1c7   : > { %683 = vmatmul.msk.bf16.vlgmr.msra.gmra.mxu1 %vm364_vm2, %v695_v59 }
 0x244   : > { %v515_v62 = vpop.f32.mrf.mxu1 }
 0x245   : > { %v516_v63 = vadd.f32 %v515_v62, %v473_v61 }
 0x247   : > { %v520_v5 = vmax.f32 %v516_v63, 0.0 }
 0x249   : > { %v522_v10 = vadd.f32 %v520_v5, %v402_v6 }
 0x24c   : > { %v517_v4 = vpop.f32.mrf.mxu1 }
 0x24d   : > { %v518_v7 = vadd.f32 %v517_v4, %v478_v1 }
 0x24f   : > { %v521_v9 = vmax.f32 %v518_v7, 0.0 }
 0x251   : > { %v523_v11 = vadd.f32 %v521_v9, %v403_v8 }
 0x253   : > { %v703_v12 = vpack.c.bf16 %v523_v11, %v522_v10 }
 0x255   : > { %704 = vst [vmem:[%s266_s15] sm:$0xff] %v703_v12  }
 0x256   : > { %797 = shalt.err (!%p794_p5)
}
 0x257   : > { %s853_s30 = smov 64  }
 0x258   : > { %708 = dma.vmem_to_hbm [thread:$0]  (%p929_p4), %s557_s16, 128, %s559_s18, %s543_s24, %s853_s30, %s853_s30, %s852_s17  }
 0x259 PF: > { %p714_p6 = scmp.ge.s32.totalorder %s848_s26, 2  ;;  %s573_s13 = sand.u32 1, %s828_s21  }
 0x25a   : > { %s574_s14 = scalar_lea.sflag [#allocation7], %s573_s13 }
 0x25b   : > { %p711_p7 = pnand %p714_p6, %p936_p8 }
 0x25d   : > { %p712_p9 = pneg %p711_p7 }
 0x25f   : > { %823 = dma.done.wait (%p712_p9), %s574_s14, 128  }
 0x260   : > { %825 = vsyncadd (%p712_p9), %s574_s14, 4294967168  ;;  %s19_s26 = sadd.s32 1, %s848_s26   ;;  %s1042_s21 = smov %s832_s22 }
 0x261   : > { %p16_p10 = scmp.ge.s32.totalorder %s19_s26, 4   ;;  %s1043_s22 = smov %s836_s23 }
 0x262   : > { %s1044_s23 = smov %s942_s10  ;;  %s1045_s24 = smov %s844_s25 }
 0x263   : > { %s1046_s25 = smov %s1048_s29  ;;  %18 = sbr.rel (!%p16_p10) target bundleno = 4 (0x4), region = 87 }
 0x268   :  { %580 = vsyncpa [#allocation7], 1 }
 0x269   :  { %582 = vsyncpa [#allocation7 + $0x1], 1 }

</bundles_post_ra>
